<compile_context>
chip_gen: v7x
topology: tpu7x:2x2x1
jax: 0.10.0
libtpu: 0.0.40
codegen_flags: <defaults>
</compile_context>

<pallas_src>
import jax
import jax.numpy as jnp
from jax.experimental import pallas as pl
from jax.experimental.pallas import tpu as pltpu


NEG_LARGE = -1e30  # bias of padded softmax columns -> exp() underflows to 0
LANE = 128
SUBLANE = 8


def mlp_kernel(x_ref, w1_ref, b1_ref, w2_ref, b2_ref, out_ref):
    # x_ref:  (TB, D_in)          flattened input tile
    # w1_ref: (D_in, H_pad)       b1_ref: (1, H_pad)      (pad cols: w=0, b=0)
    # w2_ref: (H_pad, D_out_pad)  b2_ref: (1, D_out_pad)  (pad cols: w=0, b=-1e30)
    # out_ref:(TB, D_out_pad)     softmax probabilities (pad cols == 0)
    x = x_ref[...]

    # layer_input: x @ W1 + b1   (MXU, f32 accumulation, lane-dense H_pad)
    h = jnp.dot(x, w1_ref[...], preferred_element_type=jnp.float32) + b1_ref[...]

    # TODO(synk): nn.Dropout() is identity in eval mode; training-mode dropout
    # would use pltpu.prng_seed / pltpu.prng_random_bits to build a keep mask.

    # ReLU (VPU); padded hidden columns stay exactly 0.
    h = jnp.maximum(h, 0.0)

    # layer_hidden: h @ W2 + b2  (lane-dense D_out_pad = multiple of 128)
    logits = (
        jnp.dot(h, w2_ref[...], preferred_element_type=jnp.float32) + b2_ref[...]
    )

    # Softmax over the class axis (padded columns contribute exp(~-1e30) = 0).
    m = jnp.max(logits, axis=-1, keepdims=True)
    e = jnp.exp(logits - m)
    out_ref[...] = e / jnp.sum(e, axis=-1, keepdims=True)


def _round_up(n, m):
    return pl.cdiv(n, m) * m


def mlp_forward(x, params):
    """x: (B, C, H, W) float32 -> softmax probabilities (B, dim_out)."""
    B = x.shape[0]
    dim_in = x.shape[1] * x.shape[-2] * x.shape[-1]
    dim_out = params["w2"].shape[1]
    h_pad = params["w1_pad"].shape[1]
    dim_out_pad = params["w2_pad"].shape[1]

    # x.view(-1, C*H*W) equivalent
    x_flat = x.reshape(B, dim_in).astype(jnp.float32)

    # Adaptive batch tile: single grid step for small batches, 128-row tiles
    # (parallel across cores) otherwise.
    batch_tile = min(_round_up(B, SUBLANE), LANE)
    b_pad = _round_up(B, batch_tile)
    if b_pad != B:
        x_flat = jnp.pad(x_flat, ((0, b_pad - B), (0, 0)))

    grid = (b_pad // batch_tile,)
    out = pl.pallas_call(
        mlp_kernel,
        out_shape=jax.ShapeDtypeStruct((b_pad, dim_out_pad), jnp.float32),
        grid_spec=pltpu.PrefetchScalarGridSpec(
            num_scalar_prefetch=0,
            grid=grid,
            in_specs=[
                pl.BlockSpec((batch_tile, dim_in), lambda i: (i, 0)),
                pl.BlockSpec((dim_in, h_pad), lambda i: (0, 0)),
                pl.BlockSpec((1, h_pad), lambda i: (0, 0)),
                pl.BlockSpec((h_pad, dim_out_pad), lambda i: (0, 0)),
                pl.BlockSpec((1, dim_out_pad), lambda i: (0, 0)),
            ],
            out_specs=pl.BlockSpec((batch_tile, dim_out_pad), lambda i: (i, 0)),
        ),
        compiler_params=pltpu.CompilerParams(
            dimension_semantics=("parallel",),
        ),
    )(x_flat, params["w1_pad"], params["b1_pad"], params["w2_pad"], params["b2_pad"])

    # Drop batch padding and the padded class columns.
    return out[:B, :dim_out]


def init_params(key, dim_in, dim_hidden, dim_out):
    """Deterministic init matching PyTorch nn.Linear (uniform(-k, k), k=1/sqrt(fan_in))."""
    k1 = 1.0 / jnp.sqrt(dim_in)
    k2 = 1.0 / jnp.sqrt(dim_hidden)
    ks = jax.random.split(key, 4)
    w1 = jax.random.uniform(ks[0], (dim_hidden, dim_in), jnp.float32, -k1, k1)
    b1 = jax.random.uniform(ks[1], (dim_hidden,), jnp.float32, -k1, k1)
    w2 = jax.random.uniform(ks[2], (dim_out, dim_hidden), jnp.float32, -k2, k2)
    b2 = jax.random.uniform(ks[3], (dim_out,), jnp.float32, -k2, k2)

    h_pad = _round_up(dim_hidden, LANE)
    dim_out_pad = _round_up(dim_out, LANE)

    # Lane-dense padded copies for the kernel.
    # Hidden pads: zero weight cols + zero bias -> ReLU keeps them exactly 0.
    w1_pad = (
        jnp.zeros((dim_in, h_pad), jnp.float32).at[:, :dim_hidden].set(w1.T)
    )
    b1_pad = jnp.zeros((1, h_pad), jnp.float32).at[0, :dim_hidden].set(b1)
    # Output pads: zero weight cols, -1e30 bias -> softmax of pads == 0.
    w2_pad = (
        jnp.zeros((h_pad, dim_out_pad), jnp.float32)
        .at[:dim_hidden, :dim_out]
        .set(w2.T)
    )
    b2_pad = (
        jnp.full((1, dim_out_pad), NEG_LARGE, jnp.float32).at[0, :dim_out].set(b2)
    )

    return {
        "w1": w1.T,                            # (dim_in, dim_hidden)   (reference)
        "b1": b1.reshape(1, dim_hidden),       # (1, dim_hidden)        (reference)
        "w2": w2.T,                            # (dim_hidden, dim_out)  (reference)
        "b2": b2.reshape(1, dim_out),          # (1, dim_out)           (reference)
        "w1_pad": w1_pad,                      # (dim_in, h_pad)
        "b1_pad": b1_pad,                      # (1, h_pad)
        "w2_pad": w2_pad,                      # (h_pad, dim_out_pad)
        "b2_pad": b2_pad,                      # (1, dim_out_pad)
    }


def reference_forward(x, params):
    """Pure-JAX reference (eval-mode forward of the PyTorch MLP)."""
    B = x.shape[0]
    x_flat = x.reshape(B, -1)
    hp = jax.lax.Precision.HIGHEST
    h = jnp.maximum(
        jnp.dot(x_flat, params["w1"], precision=hp) + params["b1"], 0.0
    )
    logits = jnp.dot(h, params["w2"], precision=hp) + params["b2"]
    return jax.nn.softmax(logits, axis=1)


if __name__ == "__main__":
    batch, channels, height, width = 2, 4, 16, 16
    dim_in = channels * height * width      # 1024
    dim_hidden = 64
    dim_out = 10

    key = jax.random.PRNGKey(0)
    kx, kp = jax.random.split(key)
    x = jax.random.normal(kx, (batch, channels, height, width), jnp.float32)
    params = init_params(kp, dim_in, dim_hidden, dim_out)

    out = mlp_forward(x, params)
    out = jax.block_until_ready(out)

    ref = reference_forward(x, params)
    assert out.shape == (batch, dim_out), out.shape
    assert jnp.allclose(jnp.sum(out, axis=1), 1.0, atol=1e-5)
    assert jnp.allclose(out, ref, atol=1e-4, rtol=1e-4), (out, ref)

    print("KERNEL_OK")
</pallas_src>

<mosaic_0001>
module attributes {stable_mosaic.version = 11 : i64} {
  func.func @mlp_kernel(%arg0: i32, %arg1: memref<8x1024xf32, #tpu.memory_space<vmem>>, %arg2: memref<1024x128xf32, #tpu.memory_space<vmem>>, %arg3: memref<1x128xf32, #tpu.memory_space<vmem>>, %arg4: memref<128x128xf32, #tpu.memory_space<vmem>>, %arg5: memref<1x128xf32, #tpu.memory_space<vmem>>, %arg6: memref<8x128xf32, #tpu.memory_space<vmem>>) attributes {dimension_semantics = [#tpu.dimension_semantics<parallel>], iteration_bounds = array<i64: 1>, scalar_prefetch = 0 : i64, scratch_operands = 0 : i64, tpu.core_type = #tpu.core_type<tc>, window_params = [{transform_indices = @transform_0, window_bounds = array<i64: 8, 1024>}, {pipeline_mode = #tpu.pipeline_mode<synchronous>, transform_indices = @transform_1, window_bounds = array<i64: 1024, 128>}, {pipeline_mode = #tpu.pipeline_mode<synchronous>, transform_indices = @transform_2, window_bounds = array<i64: 1, 128>}, {pipeline_mode = #tpu.pipeline_mode<synchronous>, transform_indices = @transform_3, window_bounds = array<i64: 128, 128>}, {pipeline_mode = #tpu.pipeline_mode<synchronous>, transform_indices = @transform_4, window_bounds = array<i64: 1, 128>}, {transform_indices = @transform_5, window_bounds = array<i64: 8, 128>}]} {
    %c0 = arith.constant 0 : index
    %c0_0 = arith.constant 0 : index
    %0 = vector.load %arg1[%c0, %c0_0] : memref<8x1024xf32, #tpu.memory_space<vmem>>, vector<8x1024xf32>
    %c0_1 = arith.constant 0 : index
    %c0_2 = arith.constant 0 : index
    %1 = vector.load %arg2[%c0_1, %c0_2] : memref<1024x128xf32, #tpu.memory_space<vmem>>, vector<1024x128xf32>
    %cst = arith.constant dense<0.000000e+00> : vector<8x128xf32>
    %2 = tpu.matmul %0, %1, %cst {dimension_numbers = #tpu.dot_dimension_numbers<[1], [0], [0], [1], [0, 0, 1, 1], [], []>} : vector<8x1024xf32>, vector<1024x128xf32>, vector<8x128xf32> -> vector<8x128xf32>
    %c0_3 = arith.constant 0 : index
    %c0_4 = arith.constant 0 : index
    %3 = vector.load %arg3[%c0_3, %c0_4] : memref<1x128xf32, #tpu.memory_space<vmem>>, vector<1x128xf32>
    %4 = vector.broadcast %3 : vector<1x128xf32> to vector<8x128xf32>
    %5 = arith.addf %2, %4 : vector<8x128xf32>
    %cst_5 = arith.constant 0.000000e+00 : f32
    %6 = vector.broadcast %cst_5 : f32 to vector<8x128xf32>
    %7 = arith.maximumf %5, %6 : vector<8x128xf32>
    %c0_6 = arith.constant 0 : index
    %c0_7 = arith.constant 0 : index
    %8 = vector.load %arg4[%c0_6, %c0_7] : memref<128x128xf32, #tpu.memory_space<vmem>>, vector<128x128xf32>
    %cst_8 = arith.constant dense<0.000000e+00> : vector<8x128xf32>
    %9 = tpu.matmul %7, %8, %cst_8 {dimension_numbers = #tpu.dot_dimension_numbers<[1], [0], [0], [1], [0, 0, 1, 1], [], []>} : vector<8x128xf32>, vector<128x128xf32>, vector<8x128xf32> -> vector<8x128xf32>
    %c0_9 = arith.constant 0 : index
    %c0_10 = arith.constant 0 : index
    %10 = vector.load %arg5[%c0_9, %c0_10] : memref<1x128xf32, #tpu.memory_space<vmem>>, vector<1x128xf32>
    %11 = vector.broadcast %10 : vector<1x128xf32> to vector<8x128xf32>
    %12 = arith.addf %9, %11 : vector<8x128xf32>
    %cst_11 = arith.constant dense<0xFF800000> : vector<8xf32>
    %13 = vector.multi_reduction <maximumf>, %12, %cst_11 [1] : vector<8x128xf32> to vector<8xf32>
    %14 = vector.shape_cast %13 : vector<8xf32> to vector<8x1xf32>
    %15 = vector.broadcast %14 : vector<8x1xf32> to vector<8x128xf32>
    %16 = arith.subf %12, %15 : vector<8x128xf32>
    %17 = math.exp %16 : vector<8x128xf32>
    %cst_12 = arith.constant dense<0.000000e+00> : vector<8xf32>
    %18 = vector.multi_reduction <add>, %17, %cst_12 [1] : vector<8x128xf32> to vector<8xf32>
    %19 = vector.shape_cast %18 : vector<8xf32> to vector<8x1xf32>
    %20 = vector.broadcast %19 : vector<8x1xf32> to vector<8x128xf32>
    %21 = arith.divf %17, %20 : vector<8x128xf32>
    %c0_13 = arith.constant 0 : index
    %c0_14 = arith.constant 0 : index
    %22 = vector.load %arg6[%c0_13, %c0_14] : memref<8x128xf32, #tpu.memory_space<vmem>>, vector<8x128xf32>
    tpu.vector_store %arg6[%c0_13, %c0_14], %21 {strides = array<i32>} : memref<8x128xf32, #tpu.memory_space<vmem>>, vector<8x128xf32>,
    return
  }
  func.func @transform_0(%arg0: i32) -> (i32, i32) {
    %c0_i32 = arith.constant 0 : i32
    %c0_i32_0 = arith.constant 0 : i32
    return %arg0, %c0_i32 : i32, i32
  }
  func.func @transform_1(%arg0: i32) -> (i32, i32) {
    %c0_i32 = arith.constant 0 : i32
    %c0_i32_0 = arith.constant 0 : i32
    %c0_i32_1 = arith.constant 0 : i32
    return %c0_i32, %c0_i32_0 : i32, i32
  }
  func.func @transform_2(%arg0: i32) -> (i32, i32) {
    %c0_i32 = arith.constant 0 : i32
    %c0_i32_0 = arith.constant 0 : i32
    %c0_i32_1 = arith.constant 0 : i32
    return %c0_i32, %c0_i32_0 : i32, i32
  }
  func.func @transform_3(%arg0: i32) -> (i32, i32) {
    %c0_i32 = arith.constant 0 : i32
    %c0_i32_0 = arith.constant 0 : i32
    %c0_i32_1 = arith.constant 0 : i32
    return %c0_i32, %c0_i32_0 : i32, i32
  }
  func.func @transform_4(%arg0: i32) -> (i32, i32) {
    %c0_i32 = arith.constant 0 : i32
    %c0_i32_0 = arith.constant 0 : i32
    %c0_i32_1 = arith.constant 0 : i32
    return %c0_i32, %c0_i32_0 : i32, i32
  }
  func.func @transform_5(%arg0: i32) -> (i32, i32) {
    %c0_i32 = arith.constant 0 : i32
    %c0_i32_0 = arith.constant 0 : i32
    return %arg0, %c0_i32 : i32, i32
  }
}

</mosaic_0001>

<bundles_post_ra>
// kernel: tpu_custom_call.1
= control target key start
LH: loop header
LB: loop body
LE: loop exit
PB: predicated region body
PF: predicated region fallthrough
CT: control target
= control target key end

     0   :  { %10 = vsyncpa [#allocation3], 0  ;;  %s1155_s0 = inlined_call_operand.hbm [shape: f32[8,1024], index: 0, kind: input, shape index: {}]   ;;  %s1156_s1 = inlined_call_operand.hbm [shape: f32[1024,128], index: 1, kind: input, shape index: {}]   ;;  %s1157_s2 = inlined_call_operand.vmem [shape: f32[1,128], index: 2, kind: input, shape index: {}]   ;;  %s1158_s3 = inlined_call_operand.hbm [shape: f32[128,128], index: 3, kind: input, shape index: {}]   ;;  %s1159_s4 = inlined_call_operand.vmem [shape: f32[1,128], index: 4, kind: input, shape index: {}]   ;;  %s1160_s5 = inlined_call_operand.hbm [shape: f32[8,128], index: 5, kind: output, shape index: {}]  }
   0x1   :  { %11 = vsyncpa [#allocation6], 0 }
   0x2   :  { %12 = vsyncpa [#allocation4], 0  ;;  %s1056_s18 = smov [#allocation5]   ;;  %s962_s22 = scalar_lea.hbm %s1156_s1, 16384 }
   0x3   :  { %s28_s19 = sshll.u32 %s1056_s18, 4  ;;  %p963_p0 = scmp.ne.s32.totalorder %s1156_s1, %s962_s22  ;;  %s29_s19 = int_to_ptr.vmem [resolvable:$true] %s28_s19 }
   0x4   :  { %p966_p1 = scmp.lt.u32.totalorder %s962_s22, %s1156_s1 }
   0x6   :  { %p968_p2 = pnand %p966_p1, %p963_p0 }
   0x8   :  { %971 = shalt.err (!%p968_p2)
}
   0x9   :  { %s972_s27 = scalar_lea.vmem %s29_s19, 16384  ;;  %p977_p4 = scmp.lt.s32.totalorder %s29_s19, %s29_s19 }
   0xa   :  { %p973_p3 = scmp.ne.s32.totalorder %s29_s19, %s972_s27  ;;  %p978_p5 = scmp.lt.s32.totalorder %s972_s27, %s972_s27 }
   0xc   :  { %p979_p6 = por %p978_p5, %p977_p4 }
   0xe   :  { %p980_p7 = pnand %p979_p6, %p973_p3 }
  0x10   :  { %983 = shalt.err (!%p980_p7)
}
  0x11   :  { %s1057_s28 = smov 128   ;;  %s1058_s29 = smov 8  }
  0x12   :  { %34 = dma.hbm_to_vmem [thread:$0]  %s1156_s1, 16384, %s29_s19, [#allocation6], %s1057_s28, %s1057_s28, %s1058_s29  }
  0x13   :  { %s1059_s7 = smov [#allocation2]   ;;  %s1060_s9 = smov [#allocation7]  }
  0x14   :  { %s19_s8 = sshll.u32 %s1059_s7, 4  ;;  %s42_s10 = sshll.u32 %s1060_s9, 4  ;;  %s20_s8 = int_to_ptr.vmem [resolvable:$true] %s19_s8  ;;  %s43_s10 = int_to_ptr.vmem [resolvable:$true] %s42_s10 }
  0x15   :  { %s984_s13 = scalar_lea.hbm %s1155_s0, 1024 }
  0x16   :  { %p985_p8 = scmp.ne.s32.totalorder %s1155_s0, %s984_s13  ;;  %p988_p9 = scmp.lt.u32.totalorder %s984_s13, %s1155_s0 }
  0x18   :  { %p990_p10 = pnand %p988_p9, %p985_p8 }
  0x1a   :  { %993 = shalt.err (!%p990_p10)
}
  0x1b   :  { %s994_s1 = scalar_lea.vmem %s20_s8, 1024  ;;  %p999_p12 = scmp.lt.s32.totalorder %s20_s8, %s20_s8 }
  0x1c   :  { %p995_p11 = scmp.ne.s32.totalorder %s20_s8, %s994_s1  ;;  %p1000_p13 = scmp.lt.s32.totalorder %s994_s1, %s994_s1 }
  0x1e   :  { %p1001_p0 = por %p1000_p13, %p999_p12 }
  0x20   :  { %p1002_p1 = pnand %p1001_p0, %p995_p11 }
  0x22   :  { %1005 = shalt.err (!%p1002_p1)
}
  0x23   :  { %22 = dma.hbm_to_vmem [thread:$0]  %s1155_s0, 1024, %s20_s8, [#allocation3]  }
  0x24   :  { %s1006_s22 = scalar_lea.hbm %s1158_s3, 2048 }
  0x25   :  { %p1007_p2 = scmp.ne.s32.totalorder %s1158_s3, %s1006_s22  ;;  %p1010_p3 = scmp.lt.u32.totalorder %s1006_s22, %s1158_s3 }
  0x27   :  { %p1012_p4 = pnand %p1010_p3, %p1007_p2 }
  0x29   :  { %1015 = shalt.err (!%p1012_p4)
}
  0x2a   :  { %s1016_s27 = scalar_lea.vmem %s43_s10, 2048  ;;  %p1021_p6 = scmp.lt.s32.totalorder %s43_s10, %s43_s10 }
  0x2b   :  { %p1017_p5 = scmp.ne.s32.totalorder %s43_s10, %s1016_s27  ;;  %p1022_p7 = scmp.lt.s32.totalorder %s1016_s27, %s1016_s27 }
  0x2d   :  { %p1023_p8 = por %p1022_p7, %p1021_p6 }
  0x2f   :  { %p1024_p9 = pnand %p1023_p8, %p1017_p5 }
  0x31   :  { %1027 = shalt.err (!%p1024_p9)
}
  0x32   :  { %48 = dma.hbm_to_vmem [thread:$0]  %s1158_s3, 2048, %s43_s10, [#allocation6], %s1057_s28, %s1057_s28, %s1058_s29  }
  0x33   :  { %1050 = dma.done.wait [#allocation3], 1024  }
  0x34   :  { %1051 = vsyncadd [#allocation3], 4294966272 }
  0x35   :  { %1052 = dma.done.wait [#allocation6], 18432  }
  0x36   :  { %1053 = vsyncadd [#allocation6], 4294948864  ;;  %v84_v0 = vld [vmem:[#allocation5 + $0x80] sm:$0xff]  ;;  %v85_v1 = vld [vmem:[#allocation5 + $0x88] sm:$0xff]  ;;  %vm1062_vm0 = vmmov 0  }
  0x37   :  { %v68_v2 = vld [vmem:[#allocation5] sm:$0xff]  ;;  %v797_v3 = vpack.c.bf16 %v85_v1, %v84_v0  ;;  %v69_v4 = vld [vmem:[#allocation5 + $0x8] sm:$0xff]  ;;  %v86_v11 = vld [vmem:[#allocation5 + $0x90] sm:$0xff] }
  0x38   :  { %v116_v5 = vld [vmem:[#allocation5 + $0x180] sm:$0xff]  ;;  %v117_v6 = vld [vmem:[#allocation5 + $0x188] sm:$0xff]  ;;  %v799_v7 = vpack.c.bf16 %v69_v4, %v68_v2  ;;  %v87_v13 = vld [vmem:[#allocation5 + $0x98] sm:$0xff] }
  0x39   :  { %v829_v8 = vpack.c.bf16 %v117_v6, %v116_v5  ;;  %v100_v9 = vld [vmem:[#allocation5 + $0x100] sm:$0xff]  ;;  %v101_v10 = vld [vmem:[#allocation5 + $0x108] sm:$0xff]  ;;  %798 = vmatprep.subr.bf16.mxu0 %v797_v3  ;;  %v70_v14 = vld [vmem:[#allocation5 + $0x10] sm:$0xff]  ;;  %v801_v16 = vpack.c.bf16 %v87_v13, %v86_v11 }
  0x3a   :  { %v831_v12 = vpack.c.bf16 %v101_v10, %v100_v9  ;;  %v71_v15 = vld [vmem:[#allocation5 + $0x18] sm:$0xff]  ;;  %800 = vmatpush3.bf16.msra.mxu0 %v799_v7  ;;  %v118_v18 = vld [vmem:[#allocation5 + $0x190] sm:$0xff]  ;;  %v88_v23 = vld [vmem:[#allocation5 + $0xa0] sm:$0xff] }
  0x3b   :  { %830 = vmatprep.subr.bf16.mxu1 %v829_v8  ;;  %v803_v17 = vpack.c.bf16 %v71_v15, %v70_v14  ;;  %v119_v19 = vld [vmem:[#allocation5 + $0x198] sm:$0xff]  ;;  %v102_v20 = vld [vmem:[#allocation5 + $0x110] sm:$0xff]  ;;  %v89_v24 = vld [vmem:[#allocation5 + $0xa8] sm:$0xff]  ;;  %802 = vmatprep.subr.bf16.mxu0 %v801_v16 }
  0x3c   :  { %832 = vmatpush3.bf16.msra.mxu1 %v831_v12  ;;  %v833_v21 = vpack.c.bf16 %v119_v19, %v118_v18  ;;  %v103_v22 = vld [vmem:[#allocation5 + $0x118] sm:$0xff]  ;;  %v805_v26 = vpack.c.bf16 %v89_v24, %v88_v23  ;;  %v72_v27 = vld [vmem:[#allocation5 + $0x20] sm:$0xff]  ;;  %v73_v28 = vld [vmem:[#allocation5 + $0x28] sm:$0xff] }
  0x3d   :  { %v835_v25 = vpack.c.bf16 %v103_v22, %v102_v20  ;;  %v120_v29 = vld [vmem:[#allocation5 + $0x1a0] sm:$0xff]  ;;  %v121_v30 = vld [vmem:[#allocation5 + $0x1a8] sm:$0xff]  ;;  %v807_v33 = vpack.c.bf16 %v73_v28, %v72_v27  ;;  %v90_v35 = vld [vmem:[#allocation5 + $0xb0] sm:$0xff] }
  0x3e   :  { %834 = vmatprep.subr.bf16.mxu1 %v833_v21  ;;  %v104_v31 = vld [vmem:[#allocation5 + $0x120] sm:$0xff]  ;;  %v105_v32 = vld [vmem:[#allocation5 + $0x128] sm:$0xff]  ;;  %804 = vmatpush3.bf16.msra.mxu0 %v803_v17  ;;  %v837_v34 = vpack.c.bf16 %v121_v30, %v120_v29  ;;  %v91_v36 = vld [vmem:[#allocation5 + $0xb8] sm:$0xff] }
  0x3f   :  { %v74_v37 = vld [vmem:[#allocation5 + $0x30] sm:$0xff]  ;;  %806 = vmatprep.subr.bf16.mxu0 %v805_v26  ;;  %v839_v38 = vpack.c.bf16 %v105_v32, %v104_v31  ;;  %v809_v39 = vpack.c.bf16 %v91_v36, %v90_v35  ;;  %v75_v40 = vld [vmem:[#allocation5 + $0x38] sm:$0xff]  ;;  %v92_v46 = vld [vmem:[#allocation5 + $0xc0] sm:$0xff] }
  0x40   :  { %836 = vmatpush3.bf16.msra.mxu1 %v835_v25  ;;  %v122_v41 = vld [vmem:[#allocation5 + $0x1b0] sm:$0xff]  ;;  %v123_v42 = vld [vmem:[#allocation5 + $0x1b8] sm:$0xff]  ;;  %v93_v47 = vld [vmem:[#allocation5 + $0xc8] sm:$0xff]  ;;  %v811_v48 = vpack.c.bf16 %v75_v40, %v74_v37 }
  0x41   :  { %838 = vmatprep.subr.bf16.mxu1 %v837_v34  ;;  %v841_v43 = vpack.c.bf16 %v123_v42, %v122_v41  ;;  %v106_v44 = vld [vmem:[#allocation5 + $0x130] sm:$0xff]  ;;  %v107_v45 = vld [vmem:[#allocation5 + $0x138] sm:$0xff]  ;;  %v124_v49 = vld [vmem:[#allocation5 + $0x1c0] sm:$0xff]  ;;  %v813_v52 = vpack.c.bf16 %v93_v47, %v92_v46 }
  0x42   :  { %808 = vmatpush3.bf16.msra.mxu0 %v807_v33  ;;  %v125_v50 = vld [vmem:[#allocation5 + $0x1c8] sm:$0xff]  ;;  %v843_v51 = vpack.c.bf16 %v107_v45, %v106_v44  ;;  %v76_v53 = vld [vmem:[#allocation5 + $0x40] sm:$0xff]  ;;  %v94_v58 = vld [vmem:[#allocation5 + $0xd0] sm:$0xff] }
  0x43   :  { %810 = vmatprep.subr.bf16.mxu0 %v809_v39  ;;  %v77_v54 = vld [vmem:[#allocation5 + $0x48] sm:$0xff]  ;;  %v108_v55 = vld [vmem:[#allocation5 + $0x140] sm:$0xff]  ;;  %v845_v56 = vpack.c.bf16 %v125_v50, %v124_v49  ;;  %v95_v59 = vld [vmem:[#allocation5 + $0xd8] sm:$0xff] }
  0x44   :  { %840 = vmatpush3.bf16.msra.mxu1 %v839_v38  ;;  %v109_v57 = vld [vmem:[#allocation5 + $0x148] sm:$0xff]  ;;  %v126_v60 = vld [vmem:[#allocation5 + $0x1d0] sm:$0xff]  ;;  %v127_v61 = vld [vmem:[#allocation5 + $0x1d8] sm:$0xff]  ;;  %v815_v62 = vpack.c.bf16 %v77_v54, %v76_v53  ;;  %v817_v0 = vpack.c.bf16 %v95_v59, %v94_v58 }
  0x45   :  { %842 = vmatprep.subr.bf16.mxu1 %v841_v43  ;;  %v847_v63 = vpack.c.bf16 %v109_v57, %v108_v55  ;;  %v78_v1 = vld [vmem:[#allocation5 + $0x50] sm:$0xff]  ;;  %v79_v2 = vld [vmem:[#allocation5 + $0x58] sm:$0xff]  ;;  %v849_v4 = vpack.c.bf16 %v127_v61, %v126_v60  ;;  %v96_v6 = vld [vmem:[#allocation5 + $0xe0] sm:$0xff] }
  0x46   :  { %812 = vmatpush3.bf16.msra.mxu0 %v811_v48  ;;  %v110_v3 = vld [vmem:[#allocation5 + $0x150] sm:$0xff]  ;;  %v111_v5 = vld [vmem:[#allocation5 + $0x158] sm:$0xff]  ;;  %v97_v7 = vld [vmem:[#allocation5 + $0xe8] sm:$0xff]  ;;  %v819_v10 = vpack.c.bf16 %v79_v2, %v78_v1 }
  0x47   :  { %814 = vmatprep.subr.bf16.mxu0 %v813_v52  ;;  %v128_v8 = vld [vmem:[#allocation5 + $0x1e0] sm:$0xff]  ;;  %v129_v9 = vld [vmem:[#allocation5 + $0x1e8] sm:$0xff]  ;;  %v851_v13 = vpack.c.bf16 %v111_v5, %v110_v3  ;;  %v821_v14 = vpack.c.bf16 %v97_v7, %v96_v6  ;;  %v98_v19 = vld [vmem:[#allocation5 + $0xf0] sm:$0xff] }
  0x48   :  { %844 = vmatpush3.bf16.msra.mxu1 %v843_v51  ;;  %v80_v11 = vld [vmem:[#allocation5 + $0x60] sm:$0xff]  ;;  %v81_v12 = vld [vmem:[#allocation5 + $0x68] sm:$0xff]  ;;  %v853_v18 = vpack.c.bf16 %v129_v9, %v128_v8  ;;  %v99_v20 = vld [vmem:[#allocation5 + $0xf8] sm:$0xff] }
  0x49   :  { %846 = vmatprep.subr.bf16.mxu1 %v845_v56  ;;  %v112_v15 = vld [vmem:[#allocation5 + $0x160] sm:$0xff]  ;;  %v113_v16 = vld [vmem:[#allocation5 + $0x168] sm:$0xff]  ;;  %v63_v21 = vld [vmem:[#allocation2 + $0x18] sm:$0xff]  ;;  %v823_v24 = vpack.c.bf16 %v81_v12, %v80_v11  ;;  %v825_v26 = vpack.c.bf16 %v99_v20, %v98_v19 }
  0x4a   :  { %816 = vmatpush3.bf16.msra.mxu0 %v815_v62  ;;  %v61_v17 = vld [vmem:[#allocation2 + $0x8] sm:$0xff]  ;;  %v130_v22 = vld [vmem:[#allocation5 + $0x1f0] sm:$0xff]  ;;  %v131_v23 = vld [vmem:[#allocation5 + $0x1f8] sm:$0xff]  ;;  %337 = vmatprep.mubr.f32.mxu1 %v63_v21  ;;  %v855_v25 = vpack.c.bf16 %v113_v16, %v112_v15 }
  0x4b   :  { %818 = vmatprep.subr.bf16.mxu0 %v817_v0  ;;  %267 = vmatprep.mubr.f32.mxu0 %v61_v17  ;;  %v82_v27 = vld [vmem:[#allocation5 + $0x70] sm:$0xff]  ;;  %v83_v28 = vld [vmem:[#allocation5 + $0x78] sm:$0xff]  ;;  %v857_v30 = vpack.c.bf16 %v131_v23, %v130_v22  ;;  %v148_v32 = vld [vmem:[#allocation5 + $0x280] sm:$0xff] }
  0x4c   :  { %848 = vmatpush3.bf16.msra.mxu1 %v847_v63  ;;  %v114_v29 = vld [vmem:[#allocation5 + $0x170] sm:$0xff]  ;;  %v115_v31 = vld [vmem:[#allocation5 + $0x178] sm:$0xff]  ;;  %v149_v33 = vld [vmem:[#allocation5 + $0x288] sm:$0xff]  ;;  %v827_v36 = vpack.c.bf16 %v83_v28, %v82_v27 }
  0x4d   :  { %850 = vmatprep.subr.bf16.mxu1 %v849_v4  ;;  %v180_v34 = vld [vmem:[#allocation5 + $0x380] sm:$0xff]  ;;  %v181_v35 = vld [vmem:[#allocation5 + $0x388] sm:$0xff]  ;;  %v859_v37 = vpack.c.bf16 %v115_v31, %v114_v29  ;;  %v861_v38 = vpack.c.bf16 %v149_v33, %v148_v32  ;;  %v150_v44 = vld [vmem:[#allocation5 + $0x290] sm:$0xff] }
  0x4e   :  { %820 = vmatpush3.bf16.msra.mxu0 %v819_v10  ;;  %v132_v39 = vld [vmem:[#allocation5 + $0x200] sm:$0xff]  ;;  %v133_v40 = vld [vmem:[#allocation5 + $0x208] sm:$0xff]  ;;  %v893_v42 = vpack.c.bf16 %v181_v35, %v180_v34  ;;  %v151_v45 = vld [vmem:[#allocation5 + $0x298] sm:$0xff] }
  0x4f   :  { %822 = vmatprep.subr.bf16.mxu0 %v821_v14  ;;  %v164_v41 = vld [vmem:[#allocation5 + $0x300] sm:$0xff]  ;;  %v165_v43 = vld [vmem:[#allocation5 + $0x308] sm:$0xff]  ;;  %v182_v46 = vld [vmem:[#allocation5 + $0x390] sm:$0xff]  ;;  %v863_v49 = vpack.c.bf16 %v133_v40, %v132_v39  ;;  %v865_v52 = vpack.c.bf16 %v151_v45, %v150_v44 }
  0x50   :  { %852 = vmatpush3.bf16.msra.mxu1 %v851_v13  ;;  %v183_v47 = vld [vmem:[#allocation5 + $0x398] sm:$0xff]  ;;  %v60_v48 = vld [vmem:[#allocation2] sm:$0xff]  ;;  %v62_v50 = vld [vmem:[#allocation2 + $0x10] sm:$0xff]  ;;  %v895_v51 = vpack.c.bf16 %v165_v43, %v164_v41 }
  0x51   :  { %854 = vmatprep.subr.bf16.mxu1 %v853_v18  ;;  %v134_v53 = vld [vmem:[#allocation5 + $0x210] sm:$0xff]  ;;  %v135_v54 = vld [vmem:[#allocation5 + $0x218] sm:$0xff]  ;;  %v897_v56 = vpack.c.bf16 %v183_v47, %v182_v46  ;;  %v152_v58 = vld [vmem:[#allocation5 + $0x2a0] sm:$0xff] }
  0x52   :  { %824 = vmatpush3.bf16.msra.mxu0 %v823_v24  ;;  %v166_v55 = vld [vmem:[#allocation5 + $0x310] sm:$0xff]  ;;  %v167_v57 = vld [vmem:[#allocation5 + $0x318] sm:$0xff]  ;;  %v153_v59 = vld [vmem:[#allocation5 + $0x2a8] sm:$0xff]  ;;  %v867_v62 = vpack.c.bf16 %v135_v54, %v134_v53 }
  0x53   :  { %826 = vmatprep.subr.bf16.mxu0 %v825_v26  ;;  %v184_v60 = vld [vmem:[#allocation5 + $0x3a0] sm:$0xff]  ;;  %v185_v61 = vld [vmem:[#allocation5 + $0x3a8] sm:$0xff]  ;;  %v899_v63 = vpack.c.bf16 %v167_v57, %v166_v55  ;;  %v869_v0 = vpack.c.bf16 %v153_v59, %v152_v58  ;;  %v154_v6 = vld [vmem:[#allocation5 + $0x2b0] sm:$0xff] }
  0x54   :  { %856 = vmatpush3.bf16.msra.mxu1 %v855_v25  ;;  %v136_v1 = vld [vmem:[#allocation5 + $0x220] sm:$0xff]  ;;  %v137_v2 = vld [vmem:[#allocation5 + $0x228] sm:$0xff]  ;;  %v901_v4 = vpack.c.bf16 %v185_v61, %v184_v60  ;;  %v155_v7 = vld [vmem:[#allocation5 + $0x2b8] sm:$0xff] }
  0x55   :  { %858 = vmatprep.subr.bf16.mxu1 %v857_v30  ;;  %v168_v3 = vld [vmem:[#allocation5 + $0x320] sm:$0xff]  ;;  %v169_v5 = vld [vmem:[#allocation5 + $0x328] sm:$0xff]  ;;  %v186_v8 = vld [vmem:[#allocation5 + $0x3b0] sm:$0xff]  ;;  %v871_v10 = vpack.c.bf16 %v137_v2, %v136_v1  ;;  %v873_v12 = vpack.c.bf16 %v155_v7, %v154_v6 }
  0x56   :  { %828 = vmatpush3.bf16.msra.mxu0 %v827_v36  ;;  %v187_v9 = vld [vmem:[#allocation5 + $0x3b8] sm:$0xff]  ;;  %v903_v11 = vpack.c.bf16 %v169_v5, %v168_v3  ;;  %v138_v13 = vld [vmem:[#allocation5 + $0x230] sm:$0xff]  ;;  %v156_v18 = vld [vmem:[#allocation5 + $0x2c0] sm:$0xff] }
  0x57   :  { %862 = vmatprep.subr.bf16.mxu0 %v861_v38  ;;  %v139_v14 = vld [vmem:[#allocation5 + $0x238] sm:$0xff]  ;;  %v170_v15 = vld [vmem:[#allocation5 + $0x330] sm:$0xff]  ;;  %v905_v16 = vpack.c.bf16 %v187_v9, %v186_v8  ;;  %v157_v19 = vld [vmem:[#allocation5 + $0x2c8] sm:$0xff] }
  0x58   :  { %860 = vmatpush3.bf16.msra.mxu1 %v859_v37  ;;  %v171_v17 = vld [vmem:[#allocation5 + $0x338] sm:$0xff]  ;;  %v188_v20 = vld [vmem:[#allocation5 + $0x3c0] sm:$0xff]  ;;  %v189_v21 = vld [vmem:[#allocation5 + $0x3c8] sm:$0xff]  ;;  %v875_v22 = vpack.c.bf16 %v139_v14, %v138_v13  ;;  %v877_v26 = vpack.c.bf16 %v157_v19, %v156_v18 }
  0x59   :  { %894 = vmatprep.subr.bf16.mxu1 %v893_v42  ;;  %268 = vmatmul.mubr.f32.vlgmr.msra.gmra.mrb[0].mxu0 %v60_v48  ;;  %v65_v23 = vld [vmem:[#allocation2 + $0x28] sm:$0xff]  ;;  %v67_v24 = vld [vmem:[#allocation2 + $0x38] sm:$0xff]  ;;  %v907_v25 = vpack.c.bf16 %v171_v17, %v170_v15  ;;  %v140_v27 = vld [vmem:[#allocation5 + $0x240] sm:$0xff]  ;;  %v909_v30 = vpack.c.bf16 %v189_v21, %v188_v20 }
  0x5a   :  { %864 = vmatpush3.bf16.msra.mxu0 %v863_v49  ;;  %v141_v28 = vld [vmem:[#allocation5 + $0x248] sm:$0xff]  ;;  %v172_v29 = vld [vmem:[#allocation5 + $0x340] sm:$0xff]  ;;  %v158_v32 = vld [vmem:[#allocation5 + $0x2d0] sm:$0xff]  ;;  %407 = vmatprep.mubr.f32.mxu0 %v65_v23 }
  0x5b   :  { %338 = vmatmul.mubr.f32.vlgmr.msra.gmra.mrb[0].mxu1 %v62_v50  ;;  %866 = vmatprep.subr.bf16.mxu0 %v865_v52  ;;  %v173_v31 = vld [vmem:[#allocation5 + $0x348] sm:$0xff]  ;;  %v159_v33 = vld [vmem:[#allocation5 + $0x2d8] sm:$0xff]  ;;  %v190_v34 = vld [vmem:[#allocation5 + $0x3d0] sm:$0xff]  ;;  %v879_v36 = vpack.c.bf16 %v141_v28, %v140_v27 }
  0x5c   :  { %896 = vmatpush3.bf16.msra.mxu1 %v895_v51  ;;  %v191_v35 = vld [vmem:[#allocation5 + $0x3d8] sm:$0xff]  ;;  %477 = vmatprep.mubr.f32.mxu1 %v67_v24  ;;  %v911_v37 = vpack.c.bf16 %v173_v31, %v172_v29  ;;  %v881_v38 = vpack.c.bf16 %v159_v33, %v158_v32  ;;  %v142_v39 = vld [vmem:[#allocation5 + $0x250] sm:$0xff]  ;;  %v160_v44 = vld [vmem:[#allocation5 + $0x2e0] sm:$0xff]  ;;  %v1063_v33 = vmov 0.0  }
  0x5d   :  { %898 = vmatprep.subr.bf16.mxu1 %v897_v56  ;;  %v143_v40 = vld [vmem:[#allocation5 + $0x258] sm:$0xff]  ;;  %v174_v41 = vld [vmem:[#allocation5 + $0x350] sm:$0xff]  ;;  %v913_v42 = vpack.c.bf16 %v191_v35, %v190_v34  ;;  %v161_v45 = vld [vmem:[#allocation5 + $0x2e8] sm:$0xff] }
  0x5e   :  { %868 = vmatpush3.bf16.msra.mxu0 %v867_v62  ;;  %v175_v43 = vld [vmem:[#allocation5 + $0x358] sm:$0xff]  ;;  %v192_v46 = vld [vmem:[#allocation5 + $0x3e0] sm:$0xff]  ;;  %v193_v47 = vld [vmem:[#allocation5 + $0x3e8] sm:$0xff]  ;;  %v883_v48 = vpack.c.bf16 %v143_v40, %v142_v39  ;;  %v885_v50 = vpack.c.bf16 %v161_v45, %v160_v44 }
  0x5f   :  { %870 = vmatprep.subr.bf16.mxu0 %v869_v0  ;;  %v915_v49 = vpack.c.bf16 %v175_v43, %v174_v41  ;;  %v144_v51 = vld [vmem:[#allocation5 + $0x260] sm:$0xff]  ;;  %v145_v52 = vld [vmem:[#allocation5 + $0x268] sm:$0xff]  ;;  %v917_v54 = vpack.c.bf16 %v193_v47, %v192_v46  ;;  %v162_v56 = vld [vmem:[#allocation5 + $0x2f0] sm:$0xff] }
  0x60   :  { %900 = vmatpush3.bf16.msra.mxu1 %v899_v63  ;;  %v176_v53 = vld [vmem:[#allocation5 + $0x360] sm:$0xff]  ;;  %v177_v55 = vld [vmem:[#allocation5 + $0x368] sm:$0xff]  ;;  %v163_v57 = vld [vmem:[#allocation5 + $0x2f8] sm:$0xff]  ;;  %v887_v60 = vpack.c.bf16 %v145_v52, %v144_v51 }
  0x61   :  { %902 = vmatprep.subr.bf16.mxu1 %v901_v4  ;;  %v194_v58 = vld [vmem:[#allocation5 + $0x3f0] sm:$0xff]  ;;  %v195_v59 = vld [vmem:[#allocation5 + $0x3f8] sm:$0xff]  ;;  %v919_v61 = vpack.c.bf16 %v177_v55, %v176_v53  ;;  %v889_v62 = vpack.c.bf16 %v163_v57, %v162_v56  ;;  %v64_v6 = vld [vmem:[#allocation2 + $0x20] sm:$0xff] }
  0x62   :  { %872 = vmatpush3.bf16.msra.mxu0 %v871_v10  ;;  %v146_v63 = vld [vmem:[#allocation5 + $0x270] sm:$0xff]  ;;  %v147_v0 = vld [vmem:[#allocation5 + $0x278] sm:$0xff]  ;;  %v921_v1 = vpack.c.bf16 %v195_v59, %v194_v58  ;;  %v484_v8 = vld [vmem:[#allocation7] sm:$0xff] }
  0x63   :  { %874 = vmatprep.subr.bf16.mxu0 %v873_v12  ;;  %v178_v2 = vld [vmem:[#allocation5 + $0x370] sm:$0xff]  ;;  %v179_v3 = vld [vmem:[#allocation5 + $0x378] sm:$0xff]  ;;  %v891_v4 = vpack.c.bf16 %v147_v0, %v146_v63  ;;  %v485_v9 = vld [vmem:[#allocation7 + $0x8] sm:$0xff] }
  0x64   :  { %904 = vmatpush3.bf16.msra.mxu1 %v903_v11  ;;  %v923_v5 = vpack.c.bf16 %v179_v3, %v178_v2  ;;  %v66_v7 = vld [vmem:[#allocation2 + $0x30] sm:$0xff]  ;;  %v1061_v11 = vmov 0.0|0.0   ;;  %v926_v12 = vpack.c.bf16 %v485_v9, %v484_v8  ;;  %v487_v13 = vld [vmem:[#allocation7 + $0x18] sm:$0xff]  ;;  %v488_v15 = vld [vmem:[#allocation7 + $0x20] sm:$0xff] }
  0x65   :  { %906 = vmatprep.subr.bf16.mxu1 %v905_v16  ;;  %v486_v10 = vld [vmem:[#allocation7 + $0x10] sm:$0xff]  ;;  %v489_v16 = vld [vmem:[#allocation7 + $0x28] sm:$0xff]  ;;  %v491_v19 = vld [vmem:[#allocation7 + $0x38] sm:$0xff] }
  0x66   :  { %876 = vmatpush3.bf16.msra.mxu0 %v875_v22  ;;  %v929_v14 = vpack.c.bf16 %v487_v13, %v486_v10  ;;  %v932_v17 = vpack.c.bf16 %v489_v16, %v488_v15  ;;  %v490_v18 = vld [vmem:[#allocation7 + $0x30] sm:$0xff]  ;;  %v492_v21 = vld [vmem:[#allocation7 + $0x40] sm:$0xff]  ;;  %v493_v22 = vld [vmem:[#allocation7 + $0x48] sm:$0xff] }
  0x67   :  { %878 = vmatprep.subr.bf16.mxu0 %v877_v26  ;;  %v935_v20 = vpack.c.bf16 %v491_v19, %v490_v18  ;;  %v938_v23 = vpack.c.bf16 %v493_v22, %v492_v21  ;;  %v494_v24 = vld [vmem:[#allocation7 + $0x50] sm:$0xff]  ;;  %v496_v27 = vld [vmem:[#allocation7 + $0x60] sm:$0xff]  ;;  %v497_v28 = vld [vmem:[#allocation7 + $0x68] sm:$0xff] }
  0x68   :  { %908 = vmatpush3.bf16.msra.mxu1 %v907_v25  ;;  %v495_v25 = vld [vmem:[#allocation7 + $0x58] sm:$0xff]  ;;  %v944_v29 = vpack.c.bf16 %v497_v28, %v496_v27  ;;  %v603_v35 = vld [vmem:[%s1157_s2] ss:$0 sm:$0xff]  ;;  %s1064_s2 = smov [#allocation8]  }
  0x69   :  { %910 = vmatprep.subr.bf16.mxu1 %v909_v30  ;;  %v941_v26 = vpack.c.bf16 %v495_v25, %v494_v24  ;;  %v498_v30 = vld [vmem:[#allocation7 + $0x70] sm:$0xff]  ;;  %v499_v31 = vld [vmem:[#allocation7 + $0x78] sm:$0xff]  ;;  %v604_v52 = vld [vmem:[%s1159_s4] ss:$0 sm:$0xff]  ;;  %s593_s7 = sshll.u32 %s1064_s2, 4  ;;  %s594_s7 = int_to_ptr.vmem [resolvable:$true] %s593_s7 }
  0x6a   :  { %880 = vmatpush3.bf16.msra.mxu0 %v879_v36  ;;  %v947_v32 = vpack.c.bf16 %v499_v31, %v498_v30  ;;  %s1028_s8 = scalar_lea.vmem %s594_s7, 128  ;;  %p1033_p11 = scmp.lt.s32.totalorder %s594_s7, %s594_s7 }
  0x6b   :  { %882 = vmatprep.subr.bf16.mxu0 %v881_v38  ;;  %p1029_p10 = scmp.ne.s32.totalorder %s594_s7, %s1028_s8  ;;  %p1034_p12 = scmp.lt.s32.totalorder %s1028_s8, %s1028_s8 }
  0x6c   :  { %912 = vmatpush3.bf16.msra.mxu1 %v911_v37 }
  0x6d   :  { %914 = vmatprep.subr.bf16.mxu1 %v913_v42  ;;  %p1035_p13 = por %p1034_p12, %p1033_p11 }
  0x6e   :  { %884 = vmatpush3.bf16.msra.mxu0 %v883_v48 }
  0x6f   :  { %886 = vmatprep.subr.bf16.mxu0 %v885_v50  ;;  %p1036_p0 = pnand %p1035_p13, %p1029_p10 }
  0x70   :  { %916 = vmatpush3.bf16.msra.mxu1 %v915_v49 }
  0x71   :  { %918 = vmatprep.subr.bf16.mxu1 %v917_v54 }
  0x72   :  { %888 = vmatpush3.bf16.msra.mxu0 %v887_v60 }
  0x73   :  { %890 = vmatprep.subr.bf16.mxu0 %v889_v62 }
  0x74   :  { %920 = vmatpush3.bf16.msra.mxu1 %v919_v61 }
  0x75   :  { %922 = vmatprep.subr.bf16.mxu1 %v921_v1 }
  0x76   :  { %892 = vmatpush3.bf16.msra.mxu0 %v891_v4 }
  0x77   :  { %925 = vmatprep.subr.bf16.mxu0 %v1061_v11 }
  0x78   :  { %924 = vmatpush3.bf16.msra.mxu1 %v923_v5 }
  0x79   :  { %408 = vmatmul.mubr.f32.vlgmr.msra.gmra.mrb[2].mxu0 %v64_v6 }
  0x7a   :  { %927 = vmatpush3.bf16.msra.mxu0 %v926_v12  ;;  %794 = vmatprep.mubr.msk.f32.mxu0 %vm1062_vm0, %v1063_v33 }
  0x7b   :  { %478 = vmatmul.mubr.f32.vlgmr.msra.gmra.mrb[2].mxu1 %v66_v7  ;;  %928 = vmatprep.subr.bf16.mxu0 %v1061_v11 }
  0x7e   :  { %930 = vmatpush3.bf16.msra.mxu0 %v929_v14 }
  0x7f   :  { %931 = vmatprep.subr.bf16.mxu0 %v1061_v11 }
  0x82   :  { %933 = vmatpush3.bf16.msra.mxu0 %v932_v17 }
  0x83   :  { %934 = vmatprep.subr.bf16.mxu0 %v1061_v11 }
  0x86   :  { %936 = vmatpush3.bf16.msra.mxu0 %v935_v20 }
  0x87   :  { %937 = vmatprep.subr.bf16.mxu0 %v1061_v11 }
  0x8a   :  { %939 = vmatpush3.bf16.msra.mxu0 %v938_v23 }
  0x8b   :  { %940 = vmatprep.subr.bf16.mxu0 %v1061_v11 }
  0x8e   :  { %942 = vmatpush3.bf16.msra.mxu0 %v941_v26 }
  0x8f   :  { %943 = vmatprep.subr.bf16.mxu0 %v1061_v11 }
  0x92   :  { %945 = vmatpush3.bf16.msra.mxu0 %v944_v29 }
  0x93   :  { %946 = vmatprep.subr.bf16.mxu0 %v1061_v11 }
  0x96   :  { %948 = vmatpush3.bf16.msra.mxu0 %v947_v32 }
 0x12c   :  { %v637_v34 = vpop.f32.mrb[0].mxu0 }
 0x12d   :  { %v638_v36 = vpop.f32.mrb[1].mxu0 }
 0x12e   :  { %v672_v37 = vpop.f32.mrb[0].mxu1  ;;  %v639_v38 = vadd.f32 %v638_v36, %v637_v34 }
 0x12f   :  { %v673_v39 = vpop.f32.mrb[1].mxu1 }
 0x130   :  { %v674_v40 = vadd.f32 %v673_v39, %v672_v37  ;;  %v270_v41 = vadd.f32 %v639_v38, %v603_v35 }
 0x132   :  { %v340_v42 = vadd.f32 %v674_v40, %v270_v41 }
 0x14c   :  { %v707_v43 = vpop.f32.mrb[2].mxu0 }
 0x14d   :  { %v708_v44 = vpop.f32.mrb[3].mxu0 }
 0x14e   :  { %v742_v45 = vpop.f32.mrb[2].mxu1  ;;  %v709_v46 = vadd.f32 %v708_v44, %v707_v43 }
 0x14f   :  { %v743_v47 = vpop.f32.mrb[3].mxu1 }
 0x150   :  { %v744_v48 = vadd.f32 %v743_v47, %v742_v45  ;;  %v410_v49 = vadd.f32 %v709_v46, %v340_v42 }
 0x152   :  { %v480_v50 = vadd.f32 %v744_v48, %v410_v49 }
 0x154   :  { %v483_v51 = vmax.f32 %v480_v50, 0.0 }
 0x156   :  { %795 = vmatmul.mubr.f32.vlgmr.msra.gmra.mrb[4].mxu0 %v483_v51 }
 0x229   :  { %v573_v53 = vpop.f32.mrb[4].mxu0 }
 0x22a   :  { %v574_v54 = vadd.f32 %v604_v52, %v573_v53  ;;  %v796_v55 = vpop.f32.mrb[5].mxu0 }
 0x22c   :  { %577 = vmax.xlane.f32.xlu0 %v574_v54 }
 0x2b9   :  { %v578_v56 = vpop.xlane.xlu0 %577 }
 0x2ba   :  { %v579_v57 = vsub.f32 %v574_v54, %v578_v56 }
 0x2bc   :  { %v580_v58 = vmul.f32 1.442695, %v579_v57 }
 0x2be   :  { %958 = vpow2.f32 %v580_v58 }
 0x2c8   :  { %v959_v59 = vpop.eup %958 }
 0x2c9   :  { %582 = vadd.xlane.f32.xlu0 %v959_v59 }
 0x356   :  { %v583_v60 = vpop.xlane.xlu0 %582 }
 0x357   :  { %960 = vrcp.f32 %v583_v60 }
 0x361   :  { %v961_v61 = vpop.eup %960 }
 0x362   :  { %v585_v62 = vmul.f32 %v961_v61, %v959_v59 }
 0x364   :  { %586 = vst [vmem:[#allocation8] sm:$0xff] %v585_v62 }
 0x365   :  { %1039 = shalt.err (!%p1036_p0)
}
 0x366   :  { %s1040_s10 = scalar_lea.hbm %s1160_s5, 128 }
 0x367   :  { %p1041_p1 = scmp.ne.s32.totalorder %s1160_s5, %s1040_s10  ;;  %p1044_p2 = scmp.lt.u32.totalorder %s1040_s10, %s1160_s5 }
 0x369   :  { %p1046_p3 = pnand %p1044_p2, %p1041_p1 }
 0x36b   :  { %1049 = shalt.err (!%p1046_p3)
}
 0x36c   :  { %596 = dma.vmem_to_hbm [thread:$0]  %s594_s7, 128, %s1160_s5, [#allocation4]  }
 0x36d   :  { %1054 = dma.done.wait [#allocation4], 128  }
 0x36e   :  { %1055 = vsyncadd [#allocation4], 4294967168 }
 0x36f   :  { %600 = vsyncpa [#allocation3], 1 }
 0x370   :  { %601 = vsyncpa [#allocation6], 1 }
 0x371   :  { %602 = vsyncpa [#allocation4], 1 }

</bundles_post_ra>
